<compile_context>
chip_gen: v7x
topology: tpu7x:2x2x1
jax: 0.10.0
libtpu: 0.0.40
codegen_flags: <defaults>
</compile_context>

<pallas_src>
import functools

import numpy as np

import jax
import jax.numpy as jnp
from jax import lax
from jax.experimental import pallas as pl
from jax.experimental.pallas import tpu as pltpu


@functools.lru_cache(maxsize=16)
def _band_dft_basis(T, fs, low_idx, high_idx, n_pad):
    """Fused, Hann-windowed, band-limited DFT basis.

    Returns a (T, 2*n_pad) bfloat16 matrix [hann*cos | hann*(-sin)] whose
    columns 1..n_band hold DFT bins [low_idx, high_idx); column 0 and columns
    > n_band are zero guard columns so the local-peak neighbour test at the
    band edges sees zeros, exactly like the reference's zeroed out-of-band
    spectrum (and so pltpu.roll wrap-around needs no masking).
    """
    del fs  # only part of the cache key
    n_band = high_idx - low_idx
    n = np.arange(T, dtype=np.float64)
    hann = 0.5 - 0.5 * np.cos(2.0 * np.pi * n / (T - 1))     # scipy hann (sym)
    k = np.arange(low_idx, high_idx, dtype=np.float64)
    ang = 2.0 * np.pi * np.outer(n, k) / T                    # (T, n_band)
    cos_b = np.zeros((T, n_pad), np.float64)
    sin_b = np.zeros((T, n_pad), np.float64)
    cos_b[:, 1:1 + n_band] = np.cos(ang) * hann[:, None]
    sin_b[:, 1:1 + n_band] = -np.sin(ang) * hann[:, None]     # FFT convention
    basis = np.concatenate([cos_b, sin_b], axis=1)
    return jnp.asarray(basis, dtype=jnp.bfloat16)


def _bvp_hr_kernel(bvp_ref, basis_ref, hr_ref, *, low_idx, n_pad, T, fs, tb):
    bvp = bvp_ref[...]                                   # (tb, T) f32

    # Per-row min-max normalization: per-row approx reciprocal (EUP, tiny) +
    # one broadcast VPU multiply; guarded against constant / zero-padded rows.
    mn = jnp.min(bvp, axis=-1, keepdims=True)
    mx = jnp.max(bvp, axis=-1, keepdims=True)
    rng = mx - mn
    inv = pl.reciprocal(jnp.where(rng > 0.0, rng, jnp.float32(1.0)), approx=True)
    x = (bvp - mn) * inv                                 # (tb, T) in [0, 1]

    # Band-limited DFT via a single fused bf16 MXU matmul (Hann window folded
    # into the basis rows, f32 accumulation).
    spec = jnp.dot(x.astype(jnp.bfloat16), basis_ref[...],
                   preferred_element_type=jnp.float32)   # (tb, 2*n_pad)
    re = spec[:, :n_pad]
    im = spec[:, n_pad:]
    # Squared magnitude: monotonic on >=0 values, so peak tests and the
    # top-1/top-2 indices match the reference's |FFT| exactly -- no sqrt.
    mag2 = re * re + im * im                             # (tb, n_pad), >= 0

    # Local maxima (scipy find_peaks: strictly greater than both neighbours).
    # Neighbour shifts via XLU lane rotates; the wrapped-in columns are the
    # zero guard columns, which also reproduce the reference's zeroed
    # out-of-band neighbours at the band edges.
    prev = pltpu.roll(mag2, shift=1, axis=1)             # col 0 <- zero guard
    nxt = pltpu.roll(mag2, shift=n_pad - 1, axis=1)      # last col <- zero guard
    is_peak = (mag2 > prev) & (mag2 > nxt)
    # TODO(synk): find_peaks plateau handling is not reproduced (strict test),
    # and the low_idx==0 / high_idx==T endpoint exclusion is assumed never hit
    # (true for fs=30 and any reasonable T).

    neg = jnp.float32(-1.0)                              # mag2 >= 0, peaks > 0
    pv = jnp.where(is_peak, mag2, neg)

    # Top-1 / top-2 peaks (ties resolved to the highest index).
    # TODO(synk): if a row has fewer than two peaks the reference raises an
    # IndexError; here the argmax falls back to an arbitrary column instead.
    j = lax.broadcasted_iota(jnp.int32, (tb, n_pad), 1)
    max1 = jnp.max(pv, axis=-1, keepdims=True)
    idx1 = jnp.max(jnp.where(pv == max1, j, -1), axis=-1, keepdims=True)
    pv2 = jnp.where(j == idx1, neg, pv)
    max2 = jnp.max(pv2, axis=-1, keepdims=True)
    idx2 = jnp.max(jnp.where(pv2 == max2, j, -1), axis=-1, keepdims=True)

    # column index -> full spectrum bin -> heart rate in BPM
    scale = jnp.float32(fs * 60.0 / float(T))
    hr1 = (idx1 + (low_idx - 1)).astype(jnp.float32) * scale
    hr2 = (idx2 + (low_idx - 1)).astype(jnp.float32) * scale

    # harmonics removal: if |hr1 - 2*hr2| < 10 -> hr2 else hr1
    hr_ref[...] = jnp.where(jnp.abs(hr1 - 2.0 * hr2) < 10.0, hr2, hr1)


def bvp_hr_loss(pre_bvp, gt_hr, fs=30.0):
    """JAX/Pallas equivalent of the PyTorch bvp_hr_loss forward pass."""
    pre_bvp = jnp.asarray(pre_bvp, jnp.float32)
    if pre_bvp.ndim == 3:
        pre_bvp = jnp.squeeze(pre_bvp, axis=1)           # keep batch dim for B==1
    B, T = pre_bvp.shape
    gt = jnp.asarray(gt_hr, jnp.float32).reshape(B)

    low_idx = int(round(0.6 / fs * T))
    high_idx = int(round(4.0 / fs * T))
    n_band = high_idx - low_idx
    n_pad = ((n_band + 2 + 127) // 128) * 128            # band + zero guards, lane-padded

    basis = _band_dft_basis(T, float(fs), low_idx, high_idx, n_pad)

    # Large batch tile for MXU occupancy / few grid steps, but never pad a
    # small batch beyond the next multiple of 8 sublanes.
    TB = min(256, ((B + 7) // 8) * 8)
    n_tiles = (B + TB - 1) // TB
    B_pad = n_tiles * TB
    if B_pad != B:
        pre_bvp = jnp.zeros((B_pad, T), jnp.float32).at[:B].set(pre_bvp)

    # ~3/4 of physical VMEM (96 MiB on v5e/v6e, 48 MiB on v7x), safe fallback.
    try:
        vmem_cap = int(pltpu.get_tpu_info().vmem_capacity_bytes)
    except Exception:
        vmem_cap = 64 * 1024 * 1024
    vmem_limit = min(vmem_cap * 3 // 4, 100 * 1024 * 1024)

    kernel = functools.partial(
        _bvp_hr_kernel, low_idx=low_idx, n_pad=n_pad, T=T, fs=float(fs), tb=TB)

    hr = pl.pallas_call(
        kernel,
        out_shape=jax.ShapeDtypeStruct((B_pad, 1), jnp.float32),
        grid=(n_tiles,),
        in_specs=[
            pl.BlockSpec((TB, T), lambda i: (i, 0)),           # bvp tile (streams)
            pl.BlockSpec((T, 2 * n_pad), lambda i: (0, 0)),    # fused basis (resident)
        ],
        out_specs=pl.BlockSpec((TB, 1), lambda i: (i, 0)),     # per-row HR
        compiler_params=pltpu.CompilerParams(
            dimension_semantics=("parallel",),                 # tiles independent
            vmem_limit_bytes=vmem_limit),
    )(pre_bvp, basis)

    # L1 loss (mean over the true batch) done in the wrapper.
    return jnp.mean(jnp.abs(hr[:B, 0] - gt))


if __name__ == "__main__":
    B, T = 2, 256
    fs = 30.0

    key = jax.random.PRNGKey(0)

    # Deterministic synthetic BVP: sinusoids at 72 / 90 BPM + small noise.
    t = jnp.arange(T, dtype=jnp.float32) / fs
    base = jnp.stack([jnp.sin(2.0 * jnp.pi * 1.2 * t),
                      jnp.sin(2.0 * jnp.pi * 1.5 * t)], axis=0)    # (B, T)
    noise = 0.3 * jax.random.normal(key, (B, T), dtype=jnp.float32)
    pre_bvp = (base + noise).reshape(B, 1, T).astype(jnp.float32)   # (B, 1, T)
    gt_hr = jnp.array([72.0, 90.0], dtype=jnp.float32)              # (B,)

    loss = bvp_hr_loss(pre_bvp, gt_hr, fs=fs)
    jax.block_until_ready(loss)
    print("KERNEL_OK")
</pallas_src>

<mosaic_0001>
module attributes {stable_mosaic.version = 11 : i64} {
  func.func @_bvp_hr_kernel(%arg0: i32, %arg1: memref<8x256xf32, #tpu.memory_space<vmem>>, %arg2: memref<256x256xbf16, #tpu.memory_space<vmem>>, %arg3: memref<8x1xf32, #tpu.memory_space<vmem>>) attributes {dimension_semantics = [#tpu.dimension_semantics<parallel>], iteration_bounds = array<i64: 1>, scalar_prefetch = 0 : i64, scratch_operands = 0 : i64, tpu.core_type = #tpu.core_type<tc>, window_params = [{transform_indices = @transform_0, window_bounds = array<i64: 8, 256>}, {pipeline_mode = #tpu.pipeline_mode<synchronous>, transform_indices = @transform_1, window_bounds = array<i64: 256, 256>}, {transform_indices = @transform_2, window_bounds = array<i64: 8, 1>}]} {
    %c0 = arith.constant 0 : index
    %c0_0 = arith.constant 0 : index
    %0 = vector.load %arg1[%c0, %c0_0] : memref<8x256xf32, #tpu.memory_space<vmem>>, vector<8x256xf32>
    %cst = arith.constant dense<0x7F800000> : vector<8xf32>
    %1 = vector.multi_reduction <minimumf>, %0, %cst [1] : vector<8x256xf32> to vector<8xf32>
    %2 = vector.shape_cast %1 : vector<8xf32> to vector<8x1xf32>
    %cst_1 = arith.constant dense<0xFF800000> : vector<8xf32>
    %3 = vector.multi_reduction <maximumf>, %0, %cst_1 [1] : vector<8x256xf32> to vector<8xf32>
    %4 = vector.shape_cast %3 : vector<8xf32> to vector<8x1xf32>
    %5 = arith.subf %4, %2 : vector<8x1xf32>
    %cst_2 = arith.constant 0.000000e+00 : f32
    %6 = vector.broadcast %cst_2 : f32 to vector<8x1xf32>
    %7 = arith.cmpf ogt, %5, %6 : vector<8x1xf32>
    %cst_3 = arith.constant 1.000000e+00 : f32
    %8 = vector.broadcast %cst_3 : f32 to vector<8x1xf32>
    %9 = arith.select %7, %5, %8 : vector<8x1xi1>, vector<8x1xf32>
    %10 = tpu.reciprocal %9 {approx = true} : vector<8x1xf32> -> vector<8x1xf32>
    %11 = vector.broadcast %2 : vector<8x1xf32> to vector<8x256xf32>
    %12 = arith.subf %0, %11 : vector<8x256xf32>
    %13 = vector.broadcast %10 : vector<8x1xf32> to vector<8x256xf32>
    %14 = arith.mulf %12, %13 : vector<8x256xf32>
    %15 = arith.truncf %14 : vector<8x256xf32> to vector<8x256xbf16>
    %c0_4 = arith.constant 0 : index
    %c0_5 = arith.constant 0 : index
    %16 = vector.load %arg2[%c0_4, %c0_5] : memref<256x256xbf16, #tpu.memory_space<vmem>>, vector<256x256xbf16>
    %cst_6 = arith.constant dense<0.000000e+00> : vector<8x256xf32>
    %17 = tpu.matmul %15, %16, %cst_6 {dimension_numbers = #tpu.dot_dimension_numbers<[1], [0], [0], [1], [0, 0, 1, 1], [], []>} : vector<8x256xbf16>, vector<256x256xbf16>, vector<8x256xf32> -> vector<8x256xf32>
    %18 = vector.extract_strided_slice %17 {offsets = [0, 0], sizes = [8, 128], strides = [1, 1]} : vector<8x256xf32> to vector<8x128xf32>
    %19 = vector.extract_strided_slice %17 {offsets = [0, 128], sizes = [8, 128], strides = [1, 1]} : vector<8x256xf32> to vector<8x128xf32>
    %20 = arith.mulf %18, %18 : vector<8x128xf32>
    %21 = arith.mulf %19, %19 : vector<8x128xf32>
    %22 = arith.addf %20, %21 : vector<8x128xf32>
    %c1_i32 = arith.constant 1 : i32
    %23 = tpu.dynamic_rotate %22 by %c1_i32 dim 1 : vector<8x128xf32>, i32 -> vector<8x128xf32>
    %c127_i32 = arith.constant 127 : i32
    %24 = tpu.dynamic_rotate %22 by %c127_i32 dim 1 : vector<8x128xf32>, i32 -> vector<8x128xf32>
    %25 = arith.cmpf ogt, %22, %23 : vector<8x128xf32>
    %26 = arith.cmpf ogt, %22, %24 : vector<8x128xf32>
    %27 = arith.andi %25, %26 : vector<8x128xi1>
    %cst_7 = arith.constant -1.000000e+00 : f32
    %28 = vector.broadcast %cst_7 : f32 to vector<8x128xf32>
    %29 = arith.select %27, %22, %28 : vector<8x128xi1>, vector<8x128xf32>
    %30 = tpu.iota {dimensions = array<i32: 1>} : vector<8x128xi32>
    %cst_8 = arith.constant dense<0xFF800000> : vector<8xf32>
    %31 = vector.multi_reduction <maximumf>, %29, %cst_8 [1] : vector<8x128xf32> to vector<8xf32>
    %32 = vector.shape_cast %31 : vector<8xf32> to vector<8x1xf32>
    %33 = vector.broadcast %32 : vector<8x1xf32> to vector<8x128xf32>
    %34 = arith.cmpf oeq, %29, %33 : vector<8x128xf32>
    %c-1_i32 = arith.constant -1 : i32
    %35 = vector.broadcast %c-1_i32 : i32 to vector<8x128xi32>
    %36 = arith.select %34, %30, %35 : vector<8x128xi1>, vector<8x128xi32>
    %cst_9 = arith.constant dense<-2147483648> : vector<8xi32>
    %37 = vector.multi_reduction <maxsi>, %36, %cst_9 [1] : vector<8x128xi32> to vector<8xi32>
    %38 = vector.shape_cast %37 : vector<8xi32> to vector<8x1xi32>
    %39 = vector.broadcast %38 : vector<8x1xi32> to vector<8x128xi32>
    %40 = arith.cmpi eq, %30, %39 : vector<8x128xi32>
    %cst_10 = arith.constant -1.000000e+00 : f32
    %41 = vector.broadcast %cst_10 : f32 to vector<8x128xf32>
    %42 = arith.select %40, %41, %29 : vector<8x128xi1>, vector<8x128xf32>
    %cst_11 = arith.constant dense<0xFF800000> : vector<8xf32>
    %43 = vector.multi_reduction <maximumf>, %42, %cst_11 [1] : vector<8x128xf32> to vector<8xf32>
    %44 = vector.shape_cast %43 : vector<8xf32> to vector<8x1xf32>
    %45 = vector.broadcast %44 : vector<8x1xf32> to vector<8x128xf32>
    %46 = arith.cmpf oeq, %42, %45 : vector<8x128xf32>
    %c-1_i32_12 = arith.constant -1 : i32
    %47 = vector.broadcast %c-1_i32_12 : i32 to vector<8x128xi32>
    %48 = arith.select %46, %30, %47 : vector<8x128xi1>, vector<8x128xi32>
    %cst_13 = arith.constant dense<-2147483648> : vector<8xi32>
    %49 = vector.multi_reduction <maxsi>, %48, %cst_13 [1] : vector<8x128xi32> to vector<8xi32>
    %50 = vector.shape_cast %49 : vector<8xi32> to vector<8x1xi32>
    %c4_i32 = arith.constant 4 : i32
    %51 = vector.broadcast %c4_i32 : i32 to vector<8x1xi32>
    %52 = arith.addi %38, %51 : vector<8x1xi32>
    %53 = arith.sitofp %52 : vector<8x1xi32> to vector<8x1xf32>
    %cst_14 = arith.constant 7.031250e+00 : f32
    %54 = vector.broadcast %cst_14 : f32 to vector<8x1xf32>
    %55 = arith.mulf %53, %54 : vector<8x1xf32>
    %c4_i32_15 = arith.constant 4 : i32
    %56 = vector.broadcast %c4_i32_15 : i32 to vector<8x1xi32>
    %57 = arith.addi %50, %56 : vector<8x1xi32>
    %58 = arith.sitofp %57 : vector<8x1xi32> to vector<8x1xf32>
    %cst_16 = arith.constant 7.031250e+00 : f32
    %59 = vector.broadcast %cst_16 : f32 to vector<8x1xf32>
    %60 = arith.mulf %58, %59 : vector<8x1xf32>
    %cst_17 = arith.constant 2.000000e+00 : f32
    %61 = vector.broadcast %cst_17 : f32 to vector<8x1xf32>
    %62 = arith.mulf %61, %60 : vector<8x1xf32>
    %63 = arith.subf %55, %62 : vector<8x1xf32>
    %64 = math.absf %63 : vector<8x1xf32>
    %cst_18 = arith.constant 1.000000e+01 : f32
    %65 = vector.broadcast %cst_18 : f32 to vector<8x1xf32>
    %66 = arith.cmpf olt, %64, %65 : vector<8x1xf32>
    %67 = arith.select %66, %60, %55 : vector<8x1xi1>, vector<8x1xf32>
    %c0_19 = arith.constant 0 : index
    %c0_20 = arith.constant 0 : index
    %68 = vector.load %arg3[%c0_19, %c0_20] : memref<8x1xf32, #tpu.memory_space<vmem>>, vector<8x1xf32>
    tpu.vector_store %arg3[%c0_19, %c0_20], %67 {strides = array<i32>} : memref<8x1xf32, #tpu.memory_space<vmem>>, vector<8x1xf32>,
    return
  }
  func.func @transform_0(%arg0: i32) -> (i32, i32) {
    %c0_i32 = arith.constant 0 : i32
    %c0_i32_0 = arith.constant 0 : i32
    return %arg0, %c0_i32 : i32, i32
  }
  func.func @transform_1(%arg0: i32) -> (i32, i32) {
    %c0_i32 = arith.constant 0 : i32
    %c0_i32_0 = arith.constant 0 : i32
    %c0_i32_1 = arith.constant 0 : i32
    return %c0_i32, %c0_i32_0 : i32, i32
  }
  func.func @transform_2(%arg0: i32) -> (i32, i32) {
    %c0_i32 = arith.constant 0 : i32
    %c0_i32_0 = arith.constant 0 : i32
    return %arg0, %c0_i32 : i32, i32
  }
}

</mosaic_0001>

<bundles_post_ra>
// kernel: tpu_custom_call.1
= control target key start
LH: loop header
LB: loop body
LE: loop exit
PB: predicated region body
PF: predicated region fallthrough
CT: control target
= control target key end

     0   :  { %7 = vsyncpa [#allocation3], 0  ;;  %s559_s0 = inlined_call_operand.hbm [shape: f32[8,256], index: 0, kind: input, shape index: {}]   ;;  %s560_s1 = inlined_call_operand.hbm [shape: bf16[256,256], index: 1, kind: input, shape index: {}]   ;;  %s561_s2 = inlined_call_operand.vmem [shape: f32[8,1], index: 2, kind: output, shape index: {}]  }
   0x1   :  { %8 = vsyncpa [#allocation5], 0  ;;  %s494_s9 = smov [#allocation2]   ;;  %s495_s11 = smov [#allocation4]  }
   0x2   :  { %s15_s10 = sshll.u32 %s494_s9, 4  ;;  %s24_s12 = sshll.u32 %s495_s11, 4  ;;  %s16_s10 = int_to_ptr.vmem [resolvable:$true] %s15_s10  ;;  %s515_s12 = int_to_ptr.vmem [resolvable:$true] %s24_s12 }
   0x3   :  { %s446_s15 = scalar_lea.hbm %s559_s0, 256 }
   0x4   :  { %p447_p0 = scmp.ne.s32.totalorder %s559_s0, %s446_s15  ;;  %p450_p1 = scmp.lt.u32.totalorder %s446_s15, %s559_s0 }
   0x6   :  { %p452_p2 = pnand %p450_p1, %p447_p0 }
   0x8   :  { %455 = shalt.err (!%p452_p2)
}
   0x9   :  { %s456_s20 = scalar_lea.vmem %s16_s10, 256  ;;  %p461_p4 = scmp.lt.s32.totalorder %s16_s10, %s16_s10 }
   0xa   :  { %p457_p3 = scmp.ne.s32.totalorder %s16_s10, %s456_s20  ;;  %p462_p5 = scmp.lt.s32.totalorder %s456_s20, %s456_s20 }
   0xc   :  { %p463_p6 = por %p462_p5, %p461_p4 }
   0xe   :  { %p464_p7 = pnand %p463_p6, %p457_p3 }
  0x10   :  { %467 = shalt.err (!%p464_p7)
}
  0x11   :  { %18 = dma.hbm_to_vmem [thread:$0]  %s559_s0, 256, %s16_s10, [#allocation3]  }
  0x12   :  { %s468_s25 = scalar_lea.hbm %s560_s1, 4096 }
  0x13   :  { %p469_p8 = scmp.ne.s32.totalorder %s560_s1, %s468_s25  ;;  %p472_p9 = scmp.lt.u32.totalorder %s468_s25, %s560_s1 }
  0x15   :  { %p474_p10 = pnand %p472_p9, %p469_p8 }
  0x17   :  { %477 = shalt.err (!%p474_p10)
}
  0x18   :  { %s478_s30 = scalar_lea.vmem %s515_s12, 4096  ;;  %p483_p12 = scmp.lt.s32.totalorder %s515_s12, %s515_s12 }
  0x19   :  { %p479_p11 = scmp.ne.s32.totalorder %s515_s12, %s478_s30  ;;  %p484_p13 = scmp.lt.s32.totalorder %s478_s30, %s478_s30 }
  0x1b   :  { %p485_p0 = por %p484_p13, %p483_p12 }
  0x1d   :  { %p486_p1 = pnand %p485_p0, %p479_p11 }
  0x1f   :  { %489 = shalt.err (!%p486_p1)
}
  0x20   :  { %s496_s0 = smov 128   ;;  %s497_s3 = smov 8  }
  0x21   :  { %30 = dma.hbm_to_vmem [thread:$0]  %s560_s1, 4096, %s515_s12, [#allocation5], %s496_s0, %s496_s0, %s497_s3  }
  0x22   :  { %490 = dma.done.wait [#allocation3], 256  }
  0x23   :  { %491 = vsyncadd [#allocation3], 4294967040 }
  0x24   :  { %492 = dma.done.wait [#allocation5], 4096  }
  0x25   :  { %493 = vsyncadd [#allocation5], 4294963200  ;;  %v546_v0 = vld [vmem:[#allocation2] sm:$0xff]  ;;  %v548_v1 = vld [vmem:[#allocation2 + $0x8] sm:$0xff]  ;;  %s498_s1 = smov 1   ;;  %s499_s6 = smov 127   ;;  %v299_v57 = vlaneseq }
  0x26   :  { %v39_v2 = vmin.f32 %v546_v0, %v548_v1  ;;  %v396_v3 = vld [vmem:[#allocation4 + $0x4] ss:$8 sps:$4 sm:$0xff]   ;;  %v398_v4 = vld [vmem:[#allocation4] ss:$8 sps:$4 sm:$0xff]   ;;  %v399_v5 = vld [vmem:[#allocation4 + $0x14] ss:$8 sps:$4 sm:$0xff]   ;;  %v42_v6 = vmax.f32 %v546_v0, %v548_v1 }
  0x27   :  { %247 = vmatprep.subr.bf16.mxu0 %v396_v3  ;;  %v401_v7 = vld [vmem:[#allocation4 + $0x10] ss:$8 sps:$4 sm:$0xff]   ;;  %v402_v8 = vld [vmem:[#allocation4 + $0x24] ss:$8 sps:$4 sm:$0xff]   ;;  %v404_v9 = vld [vmem:[#allocation4 + $0x20] ss:$8 sps:$4 sm:$0xff]  }
  0x28   :  { %40 = vmin.xlane.f32.xlu0 %v39_v2  ;;  %248 = vmatpush1.bf16.msra.mxu0 %v398_v4  ;;  %v405_v10 = vld [vmem:[#allocation4 + $0x34] ss:$8 sps:$4 sm:$0xff]   ;;  %v407_v11 = vld [vmem:[#allocation4 + $0x30] ss:$8 sps:$4 sm:$0xff]   ;;  %v408_v12 = vld [vmem:[#allocation4 + $0x44] ss:$8 sps:$4 sm:$0xff]  }
  0x29   :  { %249 = vmatprep.subr.bf16.mxu0 %v399_v5  ;;  %v410_v13 = vld [vmem:[#allocation4 + $0x40] ss:$8 sps:$4 sm:$0xff]   ;;  %v411_v14 = vld [vmem:[#allocation4 + $0x54] ss:$8 sps:$4 sm:$0xff]   ;;  %v413_v15 = vld [vmem:[#allocation4 + $0x50] ss:$8 sps:$4 sm:$0xff]  }
  0x2a   :  { %v414_v16 = vld [vmem:[#allocation4 + $0x64] ss:$8 sps:$4 sm:$0xff]   ;;  %v416_v17 = vld [vmem:[#allocation4 + $0x60] ss:$8 sps:$4 sm:$0xff]   ;;  %v417_v18 = vld [vmem:[#allocation4 + $0x74] ss:$8 sps:$4 sm:$0xff]  }
  0x2b   :  { %v419_v19 = vld [vmem:[#allocation4 + $0x70] ss:$8 sps:$4 sm:$0xff]   ;;  %v420_v20 = vld [vmem:[#allocation4 + $0x84] ss:$8 sps:$4 sm:$0xff]   ;;  %v422_v21 = vld [vmem:[#allocation4 + $0x80] ss:$8 sps:$4 sm:$0xff]  }
  0x2c   :  { %43 = vmax.xlane.f32.xlu0 %v42_v6  ;;  %250 = vmatpush1.bf16.msra.mxu0 %v401_v7  ;;  %v423_v22 = vld [vmem:[#allocation4 + $0x94] ss:$8 sps:$4 sm:$0xff]   ;;  %v425_v23 = vld [vmem:[#allocation4 + $0x90] ss:$8 sps:$4 sm:$0xff]   ;;  %v426_v24 = vld [vmem:[#allocation4 + $0xa4] ss:$8 sps:$4 sm:$0xff]  }
  0x2d   :  { %251 = vmatprep.subr.bf16.mxu0 %v402_v8  ;;  %v428_v25 = vld [vmem:[#allocation4 + $0xa0] ss:$8 sps:$4 sm:$0xff]   ;;  %v429_v26 = vld [vmem:[#allocation4 + $0xb4] ss:$8 sps:$4 sm:$0xff]   ;;  %v431_v27 = vld [vmem:[#allocation4 + $0xb0] ss:$8 sps:$4 sm:$0xff]  }
  0x2e   :  { %v432_v28 = vld [vmem:[#allocation4 + $0xc4] ss:$8 sps:$4 sm:$0xff]   ;;  %v434_v29 = vld [vmem:[#allocation4 + $0xc0] ss:$8 sps:$4 sm:$0xff]   ;;  %v435_v30 = vld [vmem:[#allocation4 + $0xd4] ss:$8 sps:$4 sm:$0xff]  }
  0x2f   :  { %v437_v31 = vld [vmem:[#allocation4 + $0xd0] ss:$8 sps:$4 sm:$0xff]   ;;  %v438_v32 = vld [vmem:[#allocation4 + $0xe4] ss:$8 sps:$4 sm:$0xff]   ;;  %v440_v33 = vld [vmem:[#allocation4 + $0xe0] ss:$8 sps:$4 sm:$0xff]  }
  0x30   :  { %252 = vmatpush1.bf16.msra.mxu0 %v404_v9  ;;  %v441_v34 = vld [vmem:[#allocation4 + $0xf4] ss:$8 sps:$4 sm:$0xff]   ;;  %v443_v35 = vld [vmem:[#allocation4 + $0xf0] ss:$8 sps:$4 sm:$0xff]   ;;  %v300_v58 = vand.u32 127, %v299_v57  ;;  %vm350_vm9 = vcmask 7168  }
  0x31   :  { %253 = vmatprep.subr.bf16.mxu0 %v405_v10 }
  0x34   :  { %254 = vmatpush1.bf16.msra.mxu0 %v407_v11 }
  0x35   :  { %255 = vmatprep.subr.bf16.mxu0 %v408_v12 }
  0x38   :  { %256 = vmatpush1.bf16.msra.mxu0 %v410_v13 }
  0x39   :  { %257 = vmatprep.subr.bf16.mxu0 %v411_v14 }
  0x3c   :  { %258 = vmatpush1.bf16.msra.mxu0 %v413_v15 }
  0x3d   :  { %259 = vmatprep.subr.bf16.mxu0 %v414_v16 }
  0x40   :  { %260 = vmatpush1.bf16.msra.mxu0 %v416_v17 }
  0x41   :  { %261 = vmatprep.subr.bf16.mxu0 %v417_v18 }
  0x44   :  { %262 = vmatpush1.bf16.msra.mxu0 %v419_v19 }
  0x45   :  { %263 = vmatprep.subr.bf16.mxu0 %v420_v20 }
  0x48   :  { %264 = vmatpush1.bf16.msra.mxu0 %v422_v21 }
  0x49   :  { %265 = vmatprep.subr.bf16.mxu0 %v423_v22 }
  0x4c   :  { %266 = vmatpush1.bf16.msra.mxu0 %v425_v23 }
  0x4d   :  { %267 = vmatprep.subr.bf16.mxu0 %v426_v24 }
  0x50   :  { %268 = vmatpush1.bf16.msra.mxu0 %v428_v25 }
  0x51   :  { %269 = vmatprep.subr.bf16.mxu0 %v429_v26 }
  0x54   :  { %270 = vmatpush1.bf16.msra.mxu0 %v431_v27 }
  0x55   :  { %271 = vmatprep.subr.bf16.mxu0 %v432_v28 }
  0x58   :  { %272 = vmatpush1.bf16.msra.mxu0 %v434_v29 }
  0x59   :  { %273 = vmatprep.subr.bf16.mxu0 %v435_v30 }
  0x5c   :  { %274 = vmatpush1.bf16.msra.mxu0 %v437_v31 }
  0x5d   :  { %275 = vmatprep.subr.bf16.mxu0 %v438_v32 }
  0x60   :  { %276 = vmatpush1.bf16.msra.mxu0 %v440_v33 }
  0x61   :  { %277 = vmatprep.subr.bf16.mxu0 %v441_v34 }
  0x64   :  { %278 = vmatpush1.bf16.msra.mxu0 %v443_v35 }
  0xb5   :  { %v41_v36 = vpop.xlane.xlu0 %40 }
  0xb6   :  { %v49_v40 = vsub.f32 %v546_v0, %v41_v36  ;;  %v50_v41 = vsub.f32 %v548_v1, %v41_v36 }
  0xb9   :  { %v44_v37 = vpop.xlane.xlu0 %43 }
  0xba   :  { %v45_v38 = vsub.f32 %v44_v37, %v41_v36 }
  0xbc   :  { %vm46_vm0 = vcmp.gt.f32.partialorder %v45_v38, 0.0 }
  0xbd   :  { %v47_v39 = vsel %vm46_vm0, %v45_v38, 1.0 }
  0xbe   :  { %444 = vrcp.f32 %v47_v39 }
  0xc8   :  { %v445_v42 = vpop.eup %444 }
  0xc9   :  { %v52_v43 = vmul.f32 %v445_v42, %v50_v41  ;;  %v51_v44 = vmul.f32 %v445_v42, %v49_v40 }
  0xcb   :  { %v54_v45 = vpack.c.bf16 %v52_v43, %v52_v43  ;;  %v53_v46 = vpack.c.bf16 %v51_v44, %v51_v44 }
  0xcd   :  { %279 = vmatprep.mubr.bf16.mxu0 %v54_v45 }
  0xce   :  { %280 = vmatmul.mubr.bf16.vlgmr.msra.gmra.mrb[0].mxu0 %v53_v46 }
 0x1a1   :  { %v281_v47 = vpop.f32.mrb[0].mxu0 }
 0x1a2   :  { %v288_v48 = vmul.f32 %v281_v47, %v281_v47  ;;  %v283_v49 = vpop.f32.mrb[1].mxu0 }
 0x1a3   :  { %v289_v50 = vmul.f32 %v283_v49, %v283_v49  ;;  %v285_v51 = vpop.f32.mrb[2].mxu0 }
 0x1a4   :  { %v286_v52 = vpop.f32.mrb[3].mxu0 }
 0x1a5   :  { %v290_v53 = vadd.f32 %v289_v50, %v288_v48 }
 0x1a7   :  { %291 = vrot.lane.b32.xlu1 %v290_v53, %s498_s1 }
 0x1ab   :  { %293 = vrot.lane.b32.xlu1 %v290_v53, %s499_s6 }
 0x219   :  { %v292_v54 = vpop.permute.xlu1 %291 }
 0x21a   :  { %vm295_vm1 = vcmp.gt.f32.partialorder %v290_v53, %v292_v54 }
 0x21d   :  { %v294_v55 = vpop.permute.xlu1 %293 }
 0x21e   :  { %vm296_vm2 = vcmp.gt.f32.partialorder %v290_v53, %v294_v55 }
 0x21f   :  { %vm297_vm3 = vmand %vm295_vm1, %vm296_vm2 }
 0x220   :  { %v298_v56 = vsel %vm297_vm3, %v290_v53, -1.0 }
 0x221   :  { %301 = vmax.xlane.f32.xlu0 %v298_v56 }
 0x2ae   :  { %v302_v59 = vpop.xlane.xlu0 %301 }
 0x2af   :  { %vm303_vm4 = vcmp.eq.f32.partialorder %v298_v56, %v302_v59 }
 0x2b0   :  { %v304_v60 = vsel %vm303_vm4, %v300_v58, 4294967295 }
 0x2b1   :  { %v306_v61 = vshra.s32 %v304_v60, 16  ;;  %v305_v63 = vand.u32 65535, %v304_v60 }
 0x2b3   :  { %v308_v62 = vcvt.s32.f32 %v306_v61  ;;  %v307_v1 = vcvt.s32.f32 %v305_v63 }
 0x2b5   :  { %309 = vmax.xlane.f32.xlu1 %v308_v62 }
 0x342   :  { %v310_v0 = vpop.xlane.xlu1 %309 }
 0x343   :  { %vm311_vm5 = vcmp.eq.f32.partialorder %v308_v62, %v310_v0  ;;  %v316_v3 = vcvt.f32.s32 %v310_v0 }
 0x344   :  { %v312_v2 = vsel %vm311_vm5, %v307_v1, -inf }
 0x345   :  { %313 = vmax.xlane.f32.xlu0 %v312_v2  ;;  %v317_v5 = vshll.u32 %v316_v3, 16 }
 0x3d2   :  { %v314_v4 = vpop.xlane.xlu0 %313 }
 0x3d3   :  { %v315_v6 = vcvt.f32.s32 %v314_v4 }
 0x3d5   :  { %v318_v7 = vadd.s32 %v317_v5, %v315_v6 }
 0x3d7   :  { %vm319_vm6 = vcmp.eq.s32.totalorder %v300_v58, %v318_v7  ;;  %v339_v21 = vadd.s32 4, %v318_v7 }
 0x3d8   :  { %v320_v8 = vsel %vm319_vm6, -1.0, %v298_v56 }
 0x3d9   :  { %321 = vmax.xlane.f32.xlu0 %v320_v8  ;;  %v340_v24 = vcvt.s32.f32 %v339_v21 }
 0x3db   :  { %v341_v27 = vmul.f32 7.03125, %v340_v24 }
 0x466   :  { %v322_v9 = vpop.xlane.xlu0 %321 }
 0x467   :  { %vm323_vm7 = vcmp.eq.f32.partialorder %v320_v8, %v322_v9 }
 0x468   :  { %v324_v10 = vsel %vm323_vm7, %v300_v58, 4294967295 }
 0x469   :  { %v326_v11 = vshra.s32 %v324_v10, 16  ;;  %v325_v13 = vand.u32 65535, %v324_v10 }
 0x46b   :  { %v328_v12 = vcvt.s32.f32 %v326_v11  ;;  %v327_v15 = vcvt.s32.f32 %v325_v13 }
 0x46d   :  { %329 = vmax.xlane.f32.xlu0 %v328_v12 }
 0x4fa   :  { %v330_v14 = vpop.xlane.xlu0 %329 }
 0x4fb   :  { %vm331_vm8 = vcmp.eq.f32.partialorder %v328_v12, %v330_v14  ;;  %v336_v17 = vcvt.f32.s32 %v330_v14 }
 0x4fc   :  { %v332_v16 = vsel %vm331_vm8, %v327_v15, -inf }
 0x4fd   :  { %333 = vmax.xlane.f32.xlu0 %v332_v16  ;;  %v337_v19 = vshll.u32 %v336_v17, 16 }
 0x58a   :  { %v334_v18 = vpop.xlane.xlu0 %333 }
 0x58b   :  { %v335_v20 = vcvt.f32.s32 %v334_v18 }
 0x58d   :  { %v338_v22 = vadd.s32 %v337_v19, %v335_v20 }
 0x58f   :  { %v342_v23 = vadd.s32 4, %v338_v22 }
 0x591   :  { %v343_v25 = vcvt.s32.f32 %v342_v23 }
 0x593   :  { %v344_v26 = vmul.f32 7.03125, %v343_v25 }
 0x595   :  { %v345_v28 = vmul.f32 2.0, %v344_v26 }
 0x597   :  { %v346_v29 = vsub.f32 %v341_v27, %v345_v28 }
 0x599   :  { %v347_v30 = vand.u32 2147483647, %v346_v29 }
 0x59b   :  { %vm348_vm10 = vcmp.lt.f32.partialorder %v347_v30, 10.0 }
 0x59c   :  { %v349_v31 = vsel %vm348_vm10, %v344_v26, %v341_v27 }
 0x59d   :  { %351 = vst.msk [vmem:[%s561_s2] sm:$0xff] %vm350_vm9, %v349_v31 }
 0x59e   :  { %356 = vsyncpa [#allocation3], 1 }
 0x59f   :  { %357 = vsyncpa [#allocation5], 1 }

</bundles_post_ra>
